<compile_context>
chip_gen: v7x
topology: tpu7x:2x2x1
jax: 0.10.0
libtpu: 0.0.40
codegen_flags: <defaults>
</compile_context>

<pallas_src>
import functools

import jax
import jax.numpy as jnp
from jax.experimental import pallas as pl
from jax.experimental.pallas import tpu as pltpu


def _round_up(x, m):
    return (x + m - 1) // m * m


# ----------------------------------------------------------------------------
# Pallas kernel 1: tiled fused  out = act(x @ w + b)
#   x tile: (TM, K) bf16, w tile: (K, TN) bf16, b tile: (1, TN) f32
# ----------------------------------------------------------------------------
def _matmul_bias_act_kernel(x_ref, w_ref, b_ref, o_ref, *, apply_relu):
    acc = jnp.dot(x_ref[...], w_ref[...], preferred_element_type=jnp.float32)
    acc = acc + b_ref[...]                      # (1, TN) broadcasts over TM
    if apply_relu:
        acc = jnp.maximum(acc, 0.0)
    o_ref[...] = acc.astype(o_ref.dtype)


def matmul_bias_act(x, w, b, *, relu):
    """x: (M, K) any float, w: (K, Npad) bf16, b: (1, Npad) f32 -> (M, Npad) f32.

    Npad must be a multiple of 128 (weights are pre-padded in prepare_params).
    M is padded internally to the tile size; padded rows are sliced off.
    """
    M, K = x.shape
    K2, Npad = w.shape
    assert K == K2 and Npad % 128 == 0, (K, K2, Npad)

    TM = min(256, _round_up(M, 8))
    TN = Npad if Npad <= 512 else 512
    if Npad % TN != 0:
        TN = 128
    Mpad = _round_up(M, TM)

    xb = x.astype(jnp.bfloat16)
    if Mpad != M:
        xb = jnp.pad(xb, ((0, Mpad - M), (0, 0)))

    out = pl.pallas_call(
        functools.partial(_matmul_bias_act_kernel, apply_relu=relu),
        out_shape=jax.ShapeDtypeStruct((Mpad, Npad), jnp.float32),
        grid=(Mpad // TM, Npad // TN),
        in_specs=[
            pl.BlockSpec((TM, K), lambda i, j: (i, 0)),
            pl.BlockSpec((K, TN), lambda i, j: (0, j)),
            pl.BlockSpec((1, TN), lambda i, j: (0, j)),
        ],
        out_specs=pl.BlockSpec((TM, TN), lambda i, j: (i, j)),
        compiler_params=pltpu.CompilerParams(
            dimension_semantics=("parallel", "parallel")),
    )(xb, w, b)
    return out[:M] if Mpad != M else out


# ----------------------------------------------------------------------------
# Pallas kernel 2: fused FC head  out = (relu(x @ w1 + b1)) @ w2 + b2
#   hidden (512) never leaves VMEM.
# ----------------------------------------------------------------------------
def _fc_head_kernel(x_ref, w1_ref, b1_ref, w2_ref, b2_ref, o_ref):
    h = jnp.dot(x_ref[...], w1_ref[...], preferred_element_type=jnp.float32)
    h = jnp.maximum(h + b1_ref[...], 0.0)
    out = jnp.dot(h.astype(w2_ref.dtype), w2_ref[...],
                  preferred_element_type=jnp.float32)
    o_ref[...] = (out + b2_ref[...]).astype(o_ref.dtype)


def fc_head(x, w1, b1, w2, b2):
    """x: (M, K1); w1: (K1, H) bf16; w2: (H, Npad) bf16 -> (M, Npad) f32."""
    M, K1 = x.shape
    _, H = w1.shape
    _, Npad = w2.shape

    TM = min(256, _round_up(M, 8))
    Mpad = _round_up(M, TM)
    xb = x.astype(jnp.bfloat16)
    if Mpad != M:
        xb = jnp.pad(xb, ((0, Mpad - M), (0, 0)))

    out = pl.pallas_call(
        _fc_head_kernel,
        out_shape=jax.ShapeDtypeStruct((Mpad, Npad), jnp.float32),
        grid=(Mpad // TM,),
        in_specs=[
            pl.BlockSpec((TM, K1), lambda i: (i, 0)),
            pl.BlockSpec((K1, H), lambda i: (0, 0)),
            pl.BlockSpec((1, H), lambda i: (0, 0)),
            pl.BlockSpec((H, Npad), lambda i: (0, 0)),
            pl.BlockSpec((1, Npad), lambda i: (0, 0)),
        ],
        out_specs=pl.BlockSpec((TM, Npad), lambda i: (i, 0)),
        compiler_params=pltpu.CompilerParams(
            dimension_semantics=("parallel",)),
    )(xb, w1, b1, w2, b2)
    return out[:M] if Mpad != M else out


# ----------------------------------------------------------------------------
# Conv2d via NHWC im2col + Pallas matmul   (im2col itself is XLA glue)
# ----------------------------------------------------------------------------
def im2col_nhwc(x, kh, kw, stride):
    """x: (B, H, W, C) -> (B*Ho*Wo, kh*kw*C). K ordering is (kh, kw, C)."""
    B, H, W, C = x.shape
    Ho = (H - kh) // stride + 1
    Wo = (W - kw) // stride + 1
    patches = []
    for i in range(kh):
        for j in range(kw):
            patches.append(
                x[:, i:i + stride * Ho:stride, j:j + stride * Wo:stride, :])
    p = jnp.stack(patches, axis=3)              # (B, Ho, Wo, kh*kw, C)
    return p.reshape(B * Ho * Wo, kh * kw * C), Ho, Wo


def conv2d_relu(x_nhwc, wmat, bpad, cout, *, kh, kw, stride):
    """x: (B, H, W, Cin); wmat: (kh*kw*Cin, Npad) bf16 -> (B, Ho, Wo, cout)."""
    B = x_nhwc.shape[0]
    cols, Ho, Wo = im2col_nhwc(x_nhwc, kh, kw, stride)
    out = matmul_bias_act(cols, wmat, bpad, relu=True)   # (M, Npad) f32
    return out[:, :cout].reshape(B, Ho, Wo, cout)


# ----------------------------------------------------------------------------
# Parameter prep (done ONCE, outside the per-forward jit)
# ----------------------------------------------------------------------------
def _conv_spatial(H, W):
    h1, w1 = (H - 8) // 4 + 1, (W - 8) // 4 + 1
    h2, w2 = (h1 - 4) // 2 + 1, (w1 - 4) // 2 + 1
    h3, w3 = (h2 - 3) // 1 + 1, (w2 - 3) // 1 + 1
    return (h1, w1), (h2, w2), (h3, w3)


def prepare_params(params, input_shape, n_actions):
    """Convert PyTorch-layout params into kernel-friendly, pre-padded layout."""
    C, H, W = input_shape
    _, _, (h3, w3) = _conv_spatial(H, W)

    def conv_wb(w, b):
        cout, cin, kh, kw = w.shape
        # (Cout, Cin, kh, kw) -> (kh, kw, Cin, Cout) -> (kh*kw*Cin, Cout)
        wmat = jnp.transpose(w, (2, 3, 1, 0)).reshape(kh * kw * cin, cout)
        npad = _round_up(cout, 128)
        wmat = jnp.pad(wmat, ((0, 0), (0, npad - cout))).astype(jnp.bfloat16)
        bpad = jnp.pad(b, (0, npad - cout)).reshape(1, npad).astype(jnp.float32)
        return wmat, bpad

    c1w, c1b = conv_wb(params["c1w"], params["c1b"])
    c2w, c2b = conv_wb(params["c2w"], params["c2b"])
    c3w, c3b = conv_wb(params["c3w"], params["c3b"])

    # FC1: PyTorch flattens conv output as (C, H, W); we flatten NHWC (H, W, C),
    # so reorder the weight rows once here.
    f1w = params["f1w"]                                   # (512, conv_out)
    conv_out = f1w.shape[1]
    f1w = f1w.reshape(512, 64, h3, w3)
    f1w = jnp.transpose(f1w, (2, 3, 1, 0)).reshape(conv_out, 512)
    f1w = f1w.astype(jnp.bfloat16)
    f1b = params["f1b"].reshape(1, 512).astype(jnp.float32)

    # FC2: pre-transpose to (512, n_actions), pad N to 128 lanes.
    napad = _round_up(n_actions, 128)
    f2w = jnp.pad(params["f2w"].T, ((0, 0), (0, napad - n_actions)))
    f2w = f2w.astype(jnp.bfloat16)
    f2b = jnp.pad(params["f2b"], (0, napad - n_actions))
    f2b = f2b.reshape(1, napad).astype(jnp.float32)

    return dict(c1w=c1w, c1b=c1b, c2w=c2w, c2b=c2b, c3w=c3w, c3b=c3b,
                f1w=f1w, f1b=f1b, f2w=f2w, f2b=f2b)


# ----------------------------------------------------------------------------
# DQN forward (kernel path)
# ----------------------------------------------------------------------------
def dqn_forward(kparams, x, *, n_actions):
    h = jnp.transpose(x, (0, 2, 3, 1))                    # NCHW -> NHWC, once
    h = conv2d_relu(h, kparams["c1w"], kparams["c1b"], 32, kh=8, kw=8, stride=4)
    h = conv2d_relu(h, kparams["c2w"], kparams["c2b"], 64, kh=4, kw=4, stride=2)
    h = conv2d_relu(h, kparams["c3w"], kparams["c3b"], 64, kh=3, kw=3, stride=1)
    B = x.shape[0]
    flat = h.reshape(B, -1)          # (H, W, C) order, matched by reordered f1w
    out = fc_head(flat, kparams["f1w"], kparams["f1b"],
                  kparams["f2w"], kparams["f2b"])
    return out[:, :n_actions]


# ----------------------------------------------------------------------------
# Pure-JAX reference (PyTorch semantics) for a sanity check
# ----------------------------------------------------------------------------
def dqn_reference(params, x):
    def conv(x, w, b, stride):
        y = jax.lax.conv_general_dilated(
            x, w, window_strides=(stride, stride), padding="VALID",
            dimension_numbers=("NCHW", "OIHW", "NCHW"))
        return jax.nn.relu(y + b.reshape(1, -1, 1, 1))
    h = conv(x, params["c1w"], params["c1b"], 4)
    h = conv(h, params["c2w"], params["c2b"], 2)
    h = conv(h, params["c3w"], params["c3b"], 1)
    flat = h.reshape(x.shape[0], -1)
    h = jax.nn.relu(flat @ params["f1w"].T + params["f1b"])
    return h @ params["f2w"].T + params["f2b"]


# ----------------------------------------------------------------------------
# Init (PyTorch Conv2d/Linear default init layout & fan-in scaling)
# ----------------------------------------------------------------------------
def init_params(key, input_shape, n_actions):
    C, H, W = input_shape
    _, _, (h3, w3) = _conv_spatial(H, W)
    conv_out = 64 * h3 * w3

    ks = jax.random.split(key, 10)

    def u(k, shape, fan_in):
        bound = 1.0 / jnp.sqrt(float(fan_in))
        return jax.random.uniform(k, shape, jnp.float32, -bound, bound)

    params = {
        "c1w": u(ks[0], (32, C, 8, 8), C * 8 * 8),
        "c1b": u(ks[1], (32,), C * 8 * 8),
        "c2w": u(ks[2], (64, 32, 4, 4), 32 * 4 * 4),
        "c2b": u(ks[3], (64,), 32 * 4 * 4),
        "c3w": u(ks[4], (64, 64, 3, 3), 64 * 3 * 3),
        "c3b": u(ks[5], (64,), 64 * 3 * 3),
        "f1w": u(ks[6], (512, conv_out), conv_out),       # PyTorch Linear: (out, in)
        "f1b": u(ks[7], (512,), conv_out),
        "f2w": u(ks[8], (n_actions, 512), 512),
        "f2b": u(ks[9], (512,), 512)[:n_actions],
    }
    return params, conv_out


if __name__ == "__main__":
    # Smallest clean shapes for the 8/4 -> 4/2 -> 3/1 conv stack:
    # 36 -> 8 -> 3 -> 1 spatial, conv_out_size = 64.
    input_shape = (4, 36, 36)
    n_actions = 6
    batch = 2

    key = jax.random.PRNGKey(0)
    pkey, xkey = jax.random.split(key)
    params, conv_out = init_params(pkey, input_shape, n_actions)
    kparams = prepare_params(params, input_shape, n_actions)   # once, outside jit

    x = jax.random.normal(xkey, (batch,) + input_shape, jnp.float32)

    fwd = jax.jit(functools.partial(dqn_forward, n_actions=n_actions))
    q_values = fwd(kparams, x)
    jax.block_until_ready(q_values)

    assert q_values.shape == (batch, n_actions), q_values.shape
    assert q_values.dtype == jnp.float32

    # Sanity-check against a pure-JAX f32 reference (bf16 MXU tolerance).
    q_ref = dqn_reference(params, x)
    assert jnp.allclose(q_values, q_ref, rtol=5e-2, atol=5e-2), (
        jnp.max(jnp.abs(q_values - q_ref)))

    print("KERNEL_OK")
</pallas_src>

<mosaic_0001>
module attributes {stable_mosaic.version = 11 : i64} {
  func.func @_matmul_bias_act_kernel(%arg0: i32, %arg1: i32, %arg2: memref<128x256xbf16, #tpu.memory_space<vmem>>, %arg3: memref<256x128xbf16, #tpu.memory_space<vmem>>, %arg4: memref<1x128xf32, #tpu.memory_space<vmem>>, %arg5: memref<128x128xf32, #tpu.memory_space<vmem>>) attributes {dimension_semantics = [#tpu.dimension_semantics<parallel>, #tpu.dimension_semantics<parallel>], iteration_bounds = array<i64: 1, 1>, scalar_prefetch = 0 : i64, scratch_operands = 0 : i64, tpu.core_type = #tpu.core_type<tc>, window_params = [{transform_indices = @transform_0, window_bounds = array<i64: 128, 256>}, {transform_indices = @transform_1, window_bounds = array<i64: 256, 128>}, {transform_indices = @transform_2, window_bounds = array<i64: 1, 128>}, {transform_indices = @transform_3, window_bounds = array<i64: 128, 128>}]} {
    %c0 = arith.constant 0 : index
    %c0_0 = arith.constant 0 : index
    %0 = vector.load %arg2[%c0, %c0_0] : memref<128x256xbf16, #tpu.memory_space<vmem>>, vector<128x256xbf16>
    %c0_1 = arith.constant 0 : index
    %c0_2 = arith.constant 0 : index
    %1 = vector.load %arg3[%c0_1, %c0_2] : memref<256x128xbf16, #tpu.memory_space<vmem>>, vector<256x128xbf16>
    %cst = arith.constant dense<0.000000e+00> : vector<128x128xf32>
    %2 = tpu.matmul %0, %1, %cst {dimension_numbers = #tpu.dot_dimension_numbers<[1], [0], [0], [1], [0, 0, 1, 1], [], []>} : vector<128x256xbf16>, vector<256x128xbf16>, vector<128x128xf32> -> vector<128x128xf32>
    %c0_3 = arith.constant 0 : index
    %c0_4 = arith.constant 0 : index
    %3 = vector.load %arg4[%c0_3, %c0_4] : memref<1x128xf32, #tpu.memory_space<vmem>>, vector<1x128xf32>
    %4 = vector.broadcast %3 : vector<1x128xf32> to vector<128x128xf32>
    %5 = arith.addf %2, %4 : vector<128x128xf32>
    %cst_5 = arith.constant 0.000000e+00 : f32
    %6 = vector.broadcast %cst_5 : f32 to vector<128x128xf32>
    %7 = arith.maximumf %5, %6 : vector<128x128xf32>
    %c0_6 = arith.constant 0 : index
    %c0_7 = arith.constant 0 : index
    %8 = vector.load %arg5[%c0_6, %c0_7] : memref<128x128xf32, #tpu.memory_space<vmem>>, vector<128x128xf32>
    tpu.vector_store %arg5[%c0_6, %c0_7], %7 {strides = array<i32>} : memref<128x128xf32, #tpu.memory_space<vmem>>, vector<128x128xf32>,
    return
  }
  func.func @transform_0(%arg0: i32, %arg1: i32) -> (i32, i32) {
    %c0_i32 = arith.constant 0 : i32
    %c0_i32_0 = arith.constant 0 : i32
    return %arg0, %c0_i32 : i32, i32
  }
  func.func @transform_1(%arg0: i32, %arg1: i32) -> (i32, i32) {
    %c0_i32 = arith.constant 0 : i32
    %c0_i32_0 = arith.constant 0 : i32
    return %c0_i32, %arg1 : i32, i32
  }
  func.func @transform_2(%arg0: i32, %arg1: i32) -> (i32, i32) {
    %c0_i32 = arith.constant 0 : i32
    %c0_i32_0 = arith.constant 0 : i32
    return %c0_i32, %arg1 : i32, i32
  }
  func.func @transform_3(%arg0: i32, %arg1: i32) -> (i32, i32) {
    %c0_i32 = arith.constant 0 : i32
    return %arg0, %arg1 : i32, i32
  }
}

module attributes {stable_mosaic.version = 11 : i64} {
  func.func @_matmul_bias_act_kernel(%arg0: i32, %arg1: i32, %arg2: memref<24x512xbf16, #tpu.memory_space<vmem>>, %arg3: memref<512x128xbf16, #tpu.memory_space<vmem>>, %arg4: memref<1x128xf32, #tpu.memory_space<vmem>>, %arg5: memref<24x128xf32, #tpu.memory_space<vmem>>) attributes {dimension_semantics = [#tpu.dimension_semantics<parallel>, #tpu.dimension_semantics<parallel>], iteration_bounds = array<i64: 1, 1>, scalar_prefetch = 0 : i64, scratch_operands = 0 : i64, tpu.core_type = #tpu.core_type<tc>, window_params = [{transform_indices = @transform_0, window_bounds = array<i64: 24, 512>}, {transform_indices = @transform_1, window_bounds = array<i64: 512, 128>}, {transform_indices = @transform_2, window_bounds = array<i64: 1, 128>}, {transform_indices = @transform_3, window_bounds = array<i64: 24, 128>}]} {
    %c0 = arith.constant 0 : index
    %c0_0 = arith.constant 0 : index
    %0 = vector.load %arg2[%c0, %c0_0] : memref<24x512xbf16, #tpu.memory_space<vmem>>, vector<24x512xbf16>
    %c0_1 = arith.constant 0 : index
    %c0_2 = arith.constant 0 : index
    %1 = vector.load %arg3[%c0_1, %c0_2] : memref<512x128xbf16, #tpu.memory_space<vmem>>, vector<512x128xbf16>
    %cst = arith.constant dense<0.000000e+00> : vector<24x128xf32>
    %2 = tpu.matmul %0, %1, %cst {dimension_numbers = #tpu.dot_dimension_numbers<[1], [0], [0], [1], [0, 0, 1, 1], [], []>} : vector<24x512xbf16>, vector<512x128xbf16>, vector<24x128xf32> -> vector<24x128xf32>
    %c0_3 = arith.constant 0 : index
    %c0_4 = arith.constant 0 : index
    %3 = vector.load %arg4[%c0_3, %c0_4] : memref<1x128xf32, #tpu.memory_space<vmem>>, vector<1x128xf32>
    %4 = vector.broadcast %3 : vector<1x128xf32> to vector<24x128xf32>
    %5 = arith.addf %2, %4 : vector<24x128xf32>
    %cst_5 = arith.constant 0.000000e+00 : f32
    %6 = vector.broadcast %cst_5 : f32 to vector<24x128xf32>
    %7 = arith.maximumf %5, %6 : vector<24x128xf32>
    %c0_6 = arith.constant 0 : index
    %c0_7 = arith.constant 0 : index
    %8 = vector.load %arg5[%c0_6, %c0_7] : memref<24x128xf32, #tpu.memory_space<vmem>>, vector<24x128xf32>
    tpu.vector_store %arg5[%c0_6, %c0_7], %7 {strides = array<i32>} : memref<24x128xf32, #tpu.memory_space<vmem>>, vector<24x128xf32>,
    return
  }
  func.func @transform_0(%arg0: i32, %arg1: i32) -> (i32, i32) {
    %c0_i32 = arith.constant 0 : i32
    %c0_i32_0 = arith.constant 0 : i32
    return %arg0, %c0_i32 : i32, i32
  }
  func.func @transform_1(%arg0: i32, %arg1: i32) -> (i32, i32) {
    %c0_i32 = arith.constant 0 : i32
    %c0_i32_0 = arith.constant 0 : i32
    return %c0_i32, %arg1 : i32, i32
  }
  func.func @transform_2(%arg0: i32, %arg1: i32) -> (i32, i32) {
    %c0_i32 = arith.constant 0 : i32
    %c0_i32_0 = arith.constant 0 : i32
    return %c0_i32, %arg1 : i32, i32
  }
  func.func @transform_3(%arg0: i32, %arg1: i32) -> (i32, i32) {
    %c0_i32 = arith.constant 0 : i32
    return %arg0, %arg1 : i32, i32
  }
}

module attributes {stable_mosaic.version = 11 : i64} {
  func.func @_fc_head_kernel(%arg0: i32, %arg1: memref<8x64xbf16, #tpu.memory_space<vmem>>, %arg2: memref<64x512xbf16, #tpu.memory_space<vmem>>, %arg3: memref<1x512xf32, #tpu.memory_space<vmem>>, %arg4: memref<512x128xbf16, #tpu.memory_space<vmem>>, %arg5: memref<1x128xf32, #tpu.memory_space<vmem>>, %arg6: memref<8x128xf32, #tpu.memory_space<vmem>>) attributes {dimension_semantics = [#tpu.dimension_semantics<parallel>], iteration_bounds = array<i64: 1>, scalar_prefetch = 0 : i64, scratch_operands = 0 : i64, tpu.core_type = #tpu.core_type<tc>, window_params = [{transform_indices = @transform_0, window_bounds = array<i64: 8, 64>}, {pipeline_mode = #tpu.pipeline_mode<synchronous>, transform_indices = @transform_1, window_bounds = array<i64: 64, 512>}, {pipeline_mode = #tpu.pipeline_mode<synchronous>, transform_indices = @transform_2, window_bounds = array<i64: 1, 512>}, {pipeline_mode = #tpu.pipeline_mode<synchronous>, transform_indices = @transform_3, window_bounds = array<i64: 512, 128>}, {pipeline_mode = #tpu.pipeline_mode<synchronous>, transform_indices = @transform_4, window_bounds = array<i64: 1, 128>}, {transform_indices = @transform_5, window_bounds = array<i64: 8, 128>}]} {
    %c0 = arith.constant 0 : index
    %c0_0 = arith.constant 0 : index
    %0 = vector.load %arg1[%c0, %c0_0] : memref<8x64xbf16, #tpu.memory_space<vmem>>, vector<8x64xbf16>
    %c0_1 = arith.constant 0 : index
    %c0_2 = arith.constant 0 : index
    %1 = vector.load %arg2[%c0_1, %c0_2] : memref<64x512xbf16, #tpu.memory_space<vmem>>, vector<64x512xbf16>
    %cst = arith.constant dense<0.000000e+00> : vector<8x512xf32>
    %2 = tpu.matmul %0, %1, %cst {dimension_numbers = #tpu.dot_dimension_numbers<[1], [0], [0], [1], [0, 0, 1, 1], [], []>} : vector<8x64xbf16>, vector<64x512xbf16>, vector<8x512xf32> -> vector<8x512xf32>
    %c0_3 = arith.constant 0 : index
    %c0_4 = arith.constant 0 : index
    %3 = vector.load %arg3[%c0_3, %c0_4] : memref<1x512xf32, #tpu.memory_space<vmem>>, vector<1x512xf32>
    %4 = vector.broadcast %3 : vector<1x512xf32> to vector<8x512xf32>
    %5 = arith.addf %2, %4 : vector<8x512xf32>
    %cst_5 = arith.constant 0.000000e+00 : f32
    %6 = vector.broadcast %cst_5 : f32 to vector<8x512xf32>
    %7 = arith.maximumf %5, %6 : vector<8x512xf32>
    %8 = arith.truncf %7 : vector<8x512xf32> to vector<8x512xbf16>
    %c0_6 = arith.constant 0 : index
    %c0_7 = arith.constant 0 : index
    %9 = vector.load %arg4[%c0_6, %c0_7] : memref<512x128xbf16, #tpu.memory_space<vmem>>, vector<512x128xbf16>
    %cst_8 = arith.constant dense<0.000000e+00> : vector<8x128xf32>
    %10 = tpu.matmul %8, %9, %cst_8 {dimension_numbers = #tpu.dot_dimension_numbers<[1], [0], [0], [1], [0, 0, 1, 1], [], []>} : vector<8x512xbf16>, vector<512x128xbf16>, vector<8x128xf32> -> vector<8x128xf32>
    %c0_9 = arith.constant 0 : index
    %c0_10 = arith.constant 0 : index
    %11 = vector.load %arg5[%c0_9, %c0_10] : memref<1x128xf32, #tpu.memory_space<vmem>>, vector<1x128xf32>
    %12 = vector.broadcast %11 : vector<1x128xf32> to vector<8x128xf32>
    %13 = arith.addf %10, %12 : vector<8x128xf32>
    %c0_11 = arith.constant 0 : index
    %c0_12 = arith.constant 0 : index
    %14 = vector.load %arg6[%c0_11, %c0_12] : memref<8x128xf32, #tpu.memory_space<vmem>>, vector<8x128xf32>
    tpu.vector_store %arg6[%c0_11, %c0_12], %13 {strides = array<i32>} : memref<8x128xf32, #tpu.memory_space<vmem>>, vector<8x128xf32>,
    return
  }
  func.func @transform_0(%arg0: i32) -> (i32, i32) {
    %c0_i32 = arith.constant 0 : i32
    %c0_i32_0 = arith.constant 0 : i32
    return %arg0, %c0_i32 : i32, i32
  }
  func.func @transform_1(%arg0: i32) -> (i32, i32) {
    %c0_i32 = arith.constant 0 : i32
    %c0_i32_0 = arith.constant 0 : i32
    %c0_i32_1 = arith.constant 0 : i32
    return %c0_i32, %c0_i32_0 : i32, i32
  }
  func.func @transform_2(%arg0: i32) -> (i32, i32) {
    %c0_i32 = arith.constant 0 : i32
    %c0_i32_0 = arith.constant 0 : i32
    %c0_i32_1 = arith.constant 0 : i32
    return %c0_i32, %c0_i32_0 : i32, i32
  }
  func.func @transform_3(%arg0: i32) -> (i32, i32) {
    %c0_i32 = arith.constant 0 : i32
    %c0_i32_0 = arith.constant 0 : i32
    %c0_i32_1 = arith.constant 0 : i32
    return %c0_i32, %c0_i32_0 : i32, i32
  }
  func.func @transform_4(%arg0: i32) -> (i32, i32) {
    %c0_i32 = arith.constant 0 : i32
    %c0_i32_0 = arith.constant 0 : i32
    %c0_i32_1 = arith.constant 0 : i32
    return %c0_i32, %c0_i32_0 : i32, i32
  }
  func.func @transform_5(%arg0: i32) -> (i32, i32) {
    %c0_i32 = arith.constant 0 : i32
    %c0_i32_0 = arith.constant 0 : i32
    return %arg0, %c0_i32 : i32, i32
  }
}

module attributes {stable_mosaic.version = 11 : i64} {
  func.func @_matmul_bias_act_kernel(%arg0: i32, %arg1: i32, %arg2: memref<8x576xbf16, #tpu.memory_space<vmem>>, %arg3: memref<576x128xbf16, #tpu.memory_space<vmem>>, %arg4: memref<1x128xf32, #tpu.memory_space<vmem>>, %arg5: memref<8x128xf32, #tpu.memory_space<vmem>>) attributes {dimension_semantics = [#tpu.dimension_semantics<parallel>, #tpu.dimension_semantics<parallel>], iteration_bounds = array<i64: 1, 1>, scalar_prefetch = 0 : i64, scratch_operands = 0 : i64, tpu.core_type = #tpu.core_type<tc>, window_params = [{transform_indices = @transform_0, window_bounds = array<i64: 8, 576>}, {transform_indices = @transform_1, window_bounds = array<i64: 576, 128>}, {transform_indices = @transform_2, window_bounds = array<i64: 1, 128>}, {transform_indices = @transform_3, window_bounds = array<i64: 8, 128>}]} {
    %c0 = arith.constant 0 : index
    %c0_0 = arith.constant 0 : index
    %0 = vector.load %arg2[%c0, %c0_0] : memref<8x576xbf16, #tpu.memory_space<vmem>>, vector<8x576xbf16>
    %c0_1 = arith.constant 0 : index
    %c0_2 = arith.constant 0 : index
    %1 = vector.load %arg3[%c0_1, %c0_2] : memref<576x128xbf16, #tpu.memory_space<vmem>>, vector<576x128xbf16>
    %cst = arith.constant dense<0.000000e+00> : vector<8x128xf32>
    %2 = tpu.matmul %0, %1, %cst {dimension_numbers = #tpu.dot_dimension_numbers<[1], [0], [0], [1], [0, 0, 1, 1], [], []>} : vector<8x576xbf16>, vector<576x128xbf16>, vector<8x128xf32> -> vector<8x128xf32>
    %c0_3 = arith.constant 0 : index
    %c0_4 = arith.constant 0 : index
    %3 = vector.load %arg4[%c0_3, %c0_4] : memref<1x128xf32, #tpu.memory_space<vmem>>, vector<1x128xf32>
    %4 = vector.broadcast %3 : vector<1x128xf32> to vector<8x128xf32>
    %5 = arith.addf %2, %4 : vector<8x128xf32>
    %cst_5 = arith.constant 0.000000e+00 : f32
    %6 = vector.broadcast %cst_5 : f32 to vector<8x128xf32>
    %7 = arith.maximumf %5, %6 : vector<8x128xf32>
    %c0_6 = arith.constant 0 : index
    %c0_7 = arith.constant 0 : index
    %8 = vector.load %arg5[%c0_6, %c0_7] : memref<8x128xf32, #tpu.memory_space<vmem>>, vector<8x128xf32>
    tpu.vector_store %arg5[%c0_6, %c0_7], %7 {strides = array<i32>} : memref<8x128xf32, #tpu.memory_space<vmem>>, vector<8x128xf32>,
    return
  }
  func.func @transform_0(%arg0: i32, %arg1: i32) -> (i32, i32) {
    %c0_i32 = arith.constant 0 : i32
    %c0_i32_0 = arith.constant 0 : i32
    return %arg0, %c0_i32 : i32, i32
  }
  func.func @transform_1(%arg0: i32, %arg1: i32) -> (i32, i32) {
    %c0_i32 = arith.constant 0 : i32
    %c0_i32_0 = arith.constant 0 : i32
    return %c0_i32, %arg1 : i32, i32
  }
  func.func @transform_2(%arg0: i32, %arg1: i32) -> (i32, i32) {
    %c0_i32 = arith.constant 0 : i32
    %c0_i32_0 = arith.constant 0 : i32
    return %c0_i32, %arg1 : i32, i32
  }
  func.func @transform_3(%arg0: i32, %arg1: i32) -> (i32, i32) {
    %c0_i32 = arith.constant 0 : i32
    return %arg0, %arg1 : i32, i32
  }
}

</mosaic_0001>

<bundles_post_ra>
// kernel: dqn_forward.4
= control target key start
LH: loop header
LB: loop body
LE: loop exit
PB: predicated region body
PF: predicated region fallthrough
CT: control target
= control target key end

     0   :  { %s717_s1 = inlined_call_operand.vmem [shape: bf16[256,128], index: 1, kind: input, shape index: {}]   ;;  %s718_s0 = inlined_call_operand.vmem [shape: bf16[128,256], index: 0, kind: input, shape index: {}]   ;;  %s719_s2 = inlined_call_operand.vmem [shape: f32[1,128], index: 2, kind: input, shape index: {}]   ;;  %s720_s3 = inlined_call_operand.vmem [shape: f32[128,128], index: 3, kind: output, shape index: {}]  }
   0x1   :  { %v492_v0 = vld [vmem:[%s717_s1 + $0x40] sm:$0xff]   ;;  %v494_v2 = vld [vmem:[%s717_s1 + $0x48] sm:$0xff]   ;;  %v496_v4 = vld [vmem:[%s717_s1 + $0x50] sm:$0xff]  }
   0x2   :  { %v493_v1 = vld [vmem:[%s717_s1] sm:$0xff]   ;;  %412 = vmatprep.subr.bf16.mxu0 %v492_v0  ;;  %476 = vmatprep.subr.bf16.mxu1 %v492_v0  ;;  %v495_v3 = vld [vmem:[%s717_s1 + $0x8] sm:$0xff]   ;;  %v497_v5 = vld [vmem:[%s717_s1 + $0x10] sm:$0xff]  }
   0x3   :  { %413 = vmatpush3.bf16.msra.mxu0 %v493_v1  ;;  %484 = vmatpush3.bf16.msra.mxu1 %v493_v1  ;;  %v498_v6 = vld [vmem:[%s717_s1 + $0x58] sm:$0xff]   ;;  %v500_v8 = vld [vmem:[%s717_s1 + $0x60] sm:$0xff]   ;;  %v502_v10 = vld [vmem:[%s717_s1 + $0x68] sm:$0xff]  }
   0x4   :  { %414 = vmatprep.subr.bf16.mxu0 %v494_v2  ;;  %477 = vmatprep.subr.bf16.mxu1 %v494_v2  ;;  %v499_v7 = vld [vmem:[%s717_s1 + $0x18] sm:$0xff]   ;;  %v501_v9 = vld [vmem:[%s717_s1 + $0x20] sm:$0xff]   ;;  %v503_v13 = vld [vmem:[%s717_s1 + $0x28] sm:$0xff]  }
   0x5   :  { %v510_v11 = vld [vmem:[%s718_s0 + $0x4] ss:$8 sps:$4 sm:$0xff]   ;;  %v504_v14 = vld [vmem:[%s717_s1 + $0x70] sm:$0xff]   ;;  %v506_v16 = vld [vmem:[%s717_s1 + $0x78] sm:$0xff]  }
   0x6   :  { %v513_v12 = vld [vmem:[%s718_s0 + $0x44] ss:$8 sps:$4 sm:$0xff]   ;;  %278 = vmatprep.mubr.bf16.mxu0 %v510_v11  ;;  %v505_v15 = vld [vmem:[%s717_s1 + $0x30] sm:$0xff]   ;;  %v507_v17 = vld [vmem:[%s717_s1 + $0x38] sm:$0xff]  }
   0x7   :  { %415 = vmatpush3.bf16.msra.mxu0 %v495_v3  ;;  %485 = vmatpush3.bf16.msra.mxu1 %v495_v3  ;;  %v508_v18 = vld [vmem:[%s718_s0] ss:$8 sps:$4 sm:$0xff]   ;;  %v514_v20 = vld [vmem:[%s718_s0 + $0x14] ss:$8 sps:$4 sm:$0xff]   ;;  %v518_v22 = vld [vmem:[%s718_s0 + $0x10] ss:$8 sps:$4 sm:$0xff]  }
   0x8   :  { %416 = vmatprep.subr.bf16.mxu0 %v496_v4  ;;  %478 = vmatprep.subr.bf16.mxu1 %v496_v4  ;;  %v511_v19 = vld [vmem:[%s718_s0 + $0x40] ss:$8 sps:$4 sm:$0xff]   ;;  %v516_v21 = vld [vmem:[%s718_s0 + $0x54] ss:$8 sps:$4 sm:$0xff]   ;;  %v519_v23 = vld [vmem:[%s718_s0 + $0x50] ss:$8 sps:$4 sm:$0xff]  }
   0x9   :  { %310 = vmatprep.mubr.bf16.mxu1 %v513_v12  ;;  %v520_v24 = vld [vmem:[%s718_s0 + $0x24] ss:$8 sps:$4 sm:$0xff]   ;;  %v524_v26 = vld [vmem:[%s718_s0 + $0x20] ss:$8 sps:$4 sm:$0xff]   ;;  %v526_v28 = vld [vmem:[%s718_s0 + $0x34] ss:$8 sps:$4 sm:$0xff]  }
   0xa   :  { %v522_v25 = vld [vmem:[%s718_s0 + $0x64] ss:$8 sps:$4 sm:$0xff]   ;;  %v525_v27 = vld [vmem:[%s718_s0 + $0x60] ss:$8 sps:$4 sm:$0xff]   ;;  %v528_v29 = vld [vmem:[%s718_s0 + $0x74] ss:$8 sps:$4 sm:$0xff]  }
   0xb   :  { %417 = vmatpush3.bf16.msra.mxu0 %v497_v5  ;;  %486 = vmatpush3.bf16.msra.mxu1 %v497_v5  ;;  %v530_v30 = vld [vmem:[%s718_s0 + $0x30] ss:$8 sps:$4 sm:$0xff]   ;;  %v651_v34 = vld [vmem:[%s719_s2] ss:$0 sm:$0xff] }
   0xc   :  { %418 = vmatprep.subr.bf16.mxu0 %v498_v6  ;;  %479 = vmatprep.subr.bf16.mxu1 %v498_v6  ;;  %v531_v31 = vld [vmem:[%s718_s0 + $0x70] ss:$8 sps:$4 sm:$0xff]  }
   0xf   :  { %419 = vmatpush3.bf16.msra.mxu0 %v499_v7  ;;  %487 = vmatpush3.bf16.msra.mxu1 %v499_v7 }
  0x10   :  { %420 = vmatprep.subr.bf16.mxu0 %v500_v8  ;;  %480 = vmatprep.subr.bf16.mxu1 %v500_v8 }
  0x13   :  { %421 = vmatpush3.bf16.msra.mxu0 %v501_v9  ;;  %488 = vmatpush3.bf16.msra.mxu1 %v501_v9 }
  0x14   :  { %422 = vmatprep.subr.bf16.mxu0 %v502_v10  ;;  %481 = vmatprep.subr.bf16.mxu1 %v502_v10 }
  0x17   :  { %423 = vmatpush3.bf16.msra.mxu0 %v503_v13  ;;  %489 = vmatpush3.bf16.msra.mxu1 %v503_v13 }
  0x18   :  { %424 = vmatprep.subr.bf16.mxu0 %v504_v14  ;;  %482 = vmatprep.subr.bf16.mxu1 %v504_v14 }
  0x1b   :  { %425 = vmatpush3.bf16.msra.mxu0 %v505_v15  ;;  %490 = vmatpush3.bf16.msra.mxu1 %v505_v15 }
  0x1c   :  { %426 = vmatprep.subr.bf16.mxu0 %v506_v16  ;;  %483 = vmatprep.subr.bf16.mxu1 %v506_v16 }
  0x1f   :  { %427 = vmatpush3.bf16.msra.mxu0 %v507_v17  ;;  %491 = vmatpush3.bf16.msra.mxu1 %v507_v17 }
  0x22   :  { %279 = vmatmul.mubr.bf16.vlgmr.msra.gmra.mrb[0].mxu0 %v508_v18  ;;  %311 = vmatmul.mubr.bf16.vlgmr.msra.gmra.mrb[0].mxu1 %v511_v19 }
  0x23   :  { %286 = vmatprep.mubr.bf16.mxu0 %v514_v20  ;;  %318 = vmatprep.mubr.bf16.mxu1 %v516_v21 }
  0x2a   :  { %287 = vmatmul.mubr.bf16.gmra.mrb[4].mxu0 %v518_v22  ;;  %319 = vmatmul.mubr.bf16.gmra.mrb[4].mxu1 %v519_v23 }
  0x2b   :  { %294 = vmatprep.mubr.bf16.mxu0 %v520_v24  ;;  %326 = vmatprep.mubr.bf16.mxu1 %v522_v25 }
  0x32   :  { %295 = vmatmul.mubr.bf16.gmra.mrb[8].mxu0 %v524_v26  ;;  %327 = vmatmul.mubr.bf16.gmra.mrb[8].mxu1 %v525_v27 }
  0x33   :  { %302 = vmatprep.mubr.bf16.mxu0 %v526_v28  ;;  %334 = vmatprep.mubr.bf16.mxu1 %v528_v29 }
  0x3a   :  { %303 = vmatmul.mubr.bf16.gmra.mrb[12].mxu0 %v530_v30  ;;  %335 = vmatmul.mubr.bf16.gmra.mrb[12].mxu1 %v531_v31 }
  0xf5   :  { %v428_v32 = vpop.f32.mrb[0].mxu0  ;;  %v452_v33 = vpop.f32.mrb[0].mxu1 }
  0xf6   :  { %v429_v35 = vpop.f32.mrb[1].mxu0  ;;  %v453_v36 = vpop.f32.mrb[1].mxu1 }
  0xf7   :  { %v430_v37 = vadd.f32 %v429_v35, %v428_v32  ;;  %v454_v38 = vadd.f32 %v453_v36, %v452_v33  ;;  %v431_v39 = vpop.f32.mrb[2].mxu0  ;;  %v455_v40 = vpop.f32.mrb[2].mxu1 }
  0xf8   :  { %v432_v41 = vpop.f32.mrb[3].mxu0  ;;  %v456_v42 = vpop.f32.mrb[3].mxu1 }
  0xf9   :  { %v281_v43 = vadd.f32 %v430_v37, %v651_v34  ;;  %v313_v44 = vadd.f32 %v454_v38, %v651_v34  ;;  %v433_v45 = vadd.f32 %v432_v41, %v431_v39  ;;  %v457_v46 = vadd.f32 %v456_v42, %v455_v40 }
  0xfb   :  { %v343_v47 = vmax.f32 %v281_v43, 0.0  ;;  %v351_v48 = vmax.f32 %v313_v44, 0.0  ;;  %v284_v49 = vadd.f32 %v433_v45, %v651_v34  ;;  %v316_v50 = vadd.f32 %v457_v46, %v651_v34 }
  0xfd   :  { %359 = vst [vmem:[%s720_s3] sm:$0xff] %v343_v47  ;;  %367 = vst [vmem:[%s720_s3 + $0x40] sm:$0xff] %v351_v48  ;;  %v344_v51 = vmax.f32 %v284_v49, 0.0  ;;  %v352_v52 = vmax.f32 %v316_v50, 0.0  ;;  %v434_v53 = vpop.f32.mrb[4].mxu0  ;;  %v458_v54 = vpop.f32.mrb[4].mxu1 }
  0xfe   :  { %v435_v55 = vpop.f32.mrb[5].mxu0  ;;  %v459_v56 = vpop.f32.mrb[5].mxu1 }
  0xff   :  { %360 = vst [vmem:[%s720_s3 + $0x8] sm:$0xff] %v344_v51  ;;  %368 = vst [vmem:[%s720_s3 + $0x48] sm:$0xff] %v352_v52  ;;  %v436_v57 = vadd.f32 %v435_v55, %v434_v53  ;;  %v460_v58 = vadd.f32 %v459_v56, %v458_v54  ;;  %v437_v59 = vpop.f32.mrb[6].mxu0  ;;  %v461_v60 = vpop.f32.mrb[6].mxu1 }
 0x100   :  { %v438_v61 = vpop.f32.mrb[7].mxu0  ;;  %v462_v62 = vpop.f32.mrb[7].mxu1 }
 0x101   :  { %v289_v63 = vadd.f32 %v436_v57, %v651_v34  ;;  %v321_v0 = vadd.f32 %v460_v58, %v651_v34  ;;  %v439_v1 = vadd.f32 %v438_v61, %v437_v59  ;;  %v463_v2 = vadd.f32 %v462_v62, %v461_v60 }
 0x103   :  { %v345_v3 = vmax.f32 %v289_v63, 0.0  ;;  %v353_v4 = vmax.f32 %v321_v0, 0.0  ;;  %v292_v5 = vadd.f32 %v439_v1, %v651_v34  ;;  %v324_v6 = vadd.f32 %v463_v2, %v651_v34 }
 0x105   :  { %361 = vst [vmem:[%s720_s3 + $0x10] sm:$0xff] %v345_v3  ;;  %369 = vst [vmem:[%s720_s3 + $0x50] sm:$0xff] %v353_v4  ;;  %v346_v7 = vmax.f32 %v292_v5, 0.0  ;;  %v354_v8 = vmax.f32 %v324_v6, 0.0  ;;  %v440_v9 = vpop.f32.mrb[8].mxu0  ;;  %v464_v10 = vpop.f32.mrb[8].mxu1 }
 0x106   :  { %v441_v11 = vpop.f32.mrb[9].mxu0  ;;  %v465_v12 = vpop.f32.mrb[9].mxu1 }
 0x107   :  { %362 = vst [vmem:[%s720_s3 + $0x18] sm:$0xff] %v346_v7  ;;  %370 = vst [vmem:[%s720_s3 + $0x58] sm:$0xff] %v354_v8  ;;  %v442_v13 = vadd.f32 %v441_v11, %v440_v9  ;;  %v466_v14 = vadd.f32 %v465_v12, %v464_v10  ;;  %v443_v15 = vpop.f32.mrb[10].mxu0  ;;  %v467_v16 = vpop.f32.mrb[10].mxu1 }
 0x108   :  { %v444_v17 = vpop.f32.mrb[11].mxu0  ;;  %v468_v18 = vpop.f32.mrb[11].mxu1 }
 0x109   :  { %v297_v19 = vadd.f32 %v442_v13, %v651_v34  ;;  %v329_v20 = vadd.f32 %v466_v14, %v651_v34  ;;  %v445_v21 = vadd.f32 %v444_v17, %v443_v15  ;;  %v469_v22 = vadd.f32 %v468_v18, %v467_v16 }
 0x10b   :  { %v347_v23 = vmax.f32 %v297_v19, 0.0  ;;  %v355_v24 = vmax.f32 %v329_v20, 0.0  ;;  %v300_v25 = vadd.f32 %v445_v21, %v651_v34  ;;  %v332_v26 = vadd.f32 %v469_v22, %v651_v34 }
 0x10d   :  { %363 = vst [vmem:[%s720_s3 + $0x20] sm:$0xff] %v347_v23  ;;  %371 = vst [vmem:[%s720_s3 + $0x60] sm:$0xff] %v355_v24  ;;  %v348_v27 = vmax.f32 %v300_v25, 0.0  ;;  %v356_v28 = vmax.f32 %v332_v26, 0.0  ;;  %v446_v29 = vpop.f32.mrb[12].mxu0  ;;  %v470_v30 = vpop.f32.mrb[12].mxu1 }
 0x10e   :  { %v447_v31 = vpop.f32.mrb[13].mxu0  ;;  %v471_v32 = vpop.f32.mrb[13].mxu1 }
 0x10f   :  { %364 = vst [vmem:[%s720_s3 + $0x28] sm:$0xff] %v348_v27  ;;  %372 = vst [vmem:[%s720_s3 + $0x68] sm:$0xff] %v356_v28  ;;  %v448_v33 = vadd.f32 %v447_v31, %v446_v29  ;;  %v472_v35 = vadd.f32 %v471_v32, %v470_v30  ;;  %v449_v36 = vpop.f32.mrb[14].mxu0  ;;  %v473_v37 = vpop.f32.mrb[14].mxu1 }
 0x110   :  { %v450_v38 = vpop.f32.mrb[15].mxu0  ;;  %v474_v39 = vpop.f32.mrb[15].mxu1 }
 0x111   :  { %v305_v40 = vadd.f32 %v448_v33, %v651_v34  ;;  %v337_v41 = vadd.f32 %v472_v35, %v651_v34  ;;  %v451_v42 = vadd.f32 %v450_v38, %v449_v36  ;;  %v475_v43 = vadd.f32 %v474_v39, %v473_v37 }
 0x113   :  { %v349_v44 = vmax.f32 %v305_v40, 0.0  ;;  %v357_v45 = vmax.f32 %v337_v41, 0.0  ;;  %v308_v46 = vadd.f32 %v451_v42, %v651_v34  ;;  %v340_v47 = vadd.f32 %v475_v43, %v651_v34 }
 0x115   :  { %365 = vst [vmem:[%s720_s3 + $0x30] sm:$0xff] %v349_v44  ;;  %373 = vst [vmem:[%s720_s3 + $0x70] sm:$0xff] %v357_v45  ;;  %v350_v48 = vmax.f32 %v308_v46, 0.0  ;;  %v358_v49 = vmax.f32 %v340_v47, 0.0 }
 0x117   :  { %366 = vst [vmem:[%s720_s3 + $0x38] sm:$0xff] %v350_v48  ;;  %374 = vst [vmem:[%s720_s3 + $0x78] sm:$0xff] %v358_v49 }

// kernel: dqn_forward.5
= control target key start
LH: loop header
LB: loop body
LE: loop exit
PB: predicated region body
PF: predicated region fallthrough
CT: control target
= control target key end

     0   :  { %s709_s1 = inlined_call_operand.vmem [shape: bf16[512,128], index: 1, kind: input, shape index: {}]   ;;  %s710_s0 = inlined_call_operand.vmem [shape: bf16[24,512], index: 0, kind: input, shape index: {}]   ;;  %s711_s2 = inlined_call_operand.vmem [shape: f32[1,128], index: 2, kind: input, shape index: {}]   ;;  %s712_s3 = inlined_call_operand.vmem [shape: f32[24,128], index: 3, kind: output, shape index: {}]  }
   0x1   :  { %v521_v0 = vld [vmem:[%s709_s1 + $0x40] sm:$0xff]   ;;  %v525_v4 = vld [vmem:[%s709_s1 + $0x48] sm:$0xff]   ;;  %v529_v8 = vld [vmem:[%s709_s1 + $0x50] sm:$0xff]  }
   0x2   :  { %v522_v1 = vld [vmem:[%s709_s1 + $0xc0] sm:$0xff]   ;;  %465 = vmatprep.subr.bf16.mxu0 %v521_v0  ;;  %v526_v5 = vld [vmem:[%s709_s1 + $0xc8] sm:$0xff]   ;;  %v530_v9 = vld [vmem:[%s709_s1 + $0xd0] sm:$0xff]  }
   0x3   :  { %v523_v2 = vld [vmem:[%s709_s1] sm:$0xff]   ;;  %493 = vmatprep.subr.bf16.mxu1 %v522_v1  ;;  %v527_v6 = vld [vmem:[%s709_s1 + $0x8] sm:$0xff]   ;;  %v531_v10 = vld [vmem:[%s709_s1 + $0x10] sm:$0xff]  }
   0x4   :  { %v524_v3 = vld [vmem:[%s709_s1 + $0x80] sm:$0xff]   ;;  %466 = vmatpush3.bf16.msra.mxu0 %v523_v2  ;;  %v528_v7 = vld [vmem:[%s709_s1 + $0x88] sm:$0xff]   ;;  %v532_v11 = vld [vmem:[%s709_s1 + $0x90] sm:$0xff]  }
   0x5   :  { %494 = vmatpush3.bf16.msra.mxu1 %v524_v3  ;;  %467 = vmatprep.subr.bf16.mxu0 %v525_v4  ;;  %v533_v12 = vld [vmem:[%s709_s1 + $0x58] sm:$0xff]   ;;  %v537_v16 = vld [vmem:[%s709_s1 + $0x60] sm:$0xff]   ;;  %v541_v20 = vld [vmem:[%s709_s1 + $0x68] sm:$0xff]  }
   0x6   :  { %495 = vmatprep.subr.bf16.mxu1 %v526_v5  ;;  %v534_v13 = vld [vmem:[%s709_s1 + $0xd8] sm:$0xff]   ;;  %v538_v17 = vld [vmem:[%s709_s1 + $0xe0] sm:$0xff]   ;;  %v542_v21 = vld [vmem:[%s709_s1 + $0xe8] sm:$0xff]  }
   0x7   :  { %v535_v14 = vld [vmem:[%s709_s1 + $0x18] sm:$0xff]   ;;  %v539_v18 = vld [vmem:[%s709_s1 + $0x20] sm:$0xff]   ;;  %v543_v22 = vld [vmem:[%s709_s1 + $0x28] sm:$0xff]  }
   0x8   :  { %468 = vmatpush3.bf16.msra.mxu0 %v527_v6  ;;  %v536_v15 = vld [vmem:[%s709_s1 + $0x98] sm:$0xff]   ;;  %v540_v19 = vld [vmem:[%s709_s1 + $0xa0] sm:$0xff]   ;;  %v544_v23 = vld [vmem:[%s709_s1 + $0xa8] sm:$0xff]  }
   0x9   :  { %496 = vmatpush3.bf16.msra.mxu1 %v528_v7  ;;  %469 = vmatprep.subr.bf16.mxu0 %v529_v8  ;;  %v545_v24 = vld [vmem:[%s709_s1 + $0x70] sm:$0xff]   ;;  %v549_v28 = vld [vmem:[%s709_s1 + $0x78] sm:$0xff]   ;;  %v19_v36 = vld [vmem:[%s710_s0 + $0x20] sm:$0xff] }
   0xa   :  { %497 = vmatprep.subr.bf16.mxu1 %v530_v9  ;;  %v546_v25 = vld [vmem:[%s709_s1 + $0xf0] sm:$0xff]   ;;  %v550_v29 = vld [vmem:[%s709_s1 + $0xf8] sm:$0xff]   ;;  %v430_v37 = vcombine.high %v19_v36, %v19_v36  ;;  %v20_v38 = vld [vmem:[%s710_s0 + $0x28] sm:$0xff]  ;;  %v429_v40 = vcombine.low %v19_v36, %v19_v36 }
   0xb   :  { %v547_v26 = vld [vmem:[%s709_s1 + $0x30] sm:$0xff]   ;;  %v551_v30 = vld [vmem:[%s709_s1 + $0x38] sm:$0xff]   ;;  %v432_v39 = vcombine.high %v20_v38, %v20_v38  ;;  %v431_v41 = vcombine.low %v20_v38, %v20_v38  ;;  %v424_v44 = vld [vmem:[%s711_s2] ss:$0 sm:$0xff] }
   0xc   :  { %470 = vmatpush3.bf16.msra.mxu0 %v531_v10  ;;  %v548_v27 = vld [vmem:[%s709_s1 + $0xb0] sm:$0xff]   ;;  %v552_v31 = vld [vmem:[%s709_s1 + $0xb8] sm:$0xff]  }
   0xd   :  { %498 = vmatpush3.bf16.msra.mxu1 %v532_v11  ;;  %471 = vmatprep.subr.bf16.mxu0 %v533_v12  ;;  %v553_v32 = vld [vmem:[%s710_s0] ss:$16 sps:$4 sm:$0xff]   ;;  %v555_v33 = vld [vmem:[%s710_s0 + $0x4] ss:$16 sps:$4 sm:$0xff]   ;;  %v556_v34 = vld [vmem:[%s710_s0 + $0x8] ss:$16 sps:$4 sm:$0xff]  }
   0xe   :  { %499 = vmatprep.subr.bf16.mxu1 %v534_v13  ;;  %v558_v35 = vld [vmem:[%s710_s0 + $0xc] ss:$16 sps:$4 sm:$0xff]   ;;  %350 = vmatprep.mubr.bf16.mxu0 %v555_v33 }
   0xf   :  { %398 = vmatprep.mubr.bf16.mxu1 %v558_v35 }
  0x10   :  { %472 = vmatpush3.bf16.msra.mxu0 %v535_v14 }
  0x11   :  { %500 = vmatpush3.bf16.msra.mxu1 %v536_v15  ;;  %473 = vmatprep.subr.bf16.mxu0 %v537_v16 }
  0x12   :  { %501 = vmatprep.subr.bf16.mxu1 %v538_v17 }
  0x14   :  { %474 = vmatpush3.bf16.msra.mxu0 %v539_v18 }
  0x15   :  { %502 = vmatpush3.bf16.msra.mxu1 %v540_v19  ;;  %475 = vmatprep.subr.bf16.mxu0 %v541_v20 }
  0x16   :  { %503 = vmatprep.subr.bf16.mxu1 %v542_v21 }
  0x18   :  { %476 = vmatpush3.bf16.msra.mxu0 %v543_v22 }
  0x19   :  { %504 = vmatpush3.bf16.msra.mxu1 %v544_v23  ;;  %477 = vmatprep.subr.bf16.mxu0 %v545_v24 }
  0x1a   :  { %505 = vmatprep.subr.bf16.mxu1 %v546_v25 }
  0x1c   :  { %478 = vmatpush3.bf16.msra.mxu0 %v547_v26 }
  0x1d   :  { %506 = vmatpush3.bf16.msra.mxu1 %v548_v27  ;;  %479 = vmatprep.subr.bf16.mxu0 %v549_v28 }
  0x1e   :  { %507 = vmatprep.subr.bf16.mxu1 %v550_v29 }
  0x20   :  { %480 = vmatpush3.bf16.msra.mxu0 %v551_v30 }
  0x21   :  { %508 = vmatpush3.bf16.msra.mxu1 %v552_v31 }
  0x23   :  { %351 = vmatmul.mubr.bf16.vlgmr.msra.gmra.mrb[0].mxu0 %v553_v32 }
  0x24   :  { %399 = vmatmul.mubr.bf16.vlgmr.msra.gmra.mrb[0].mxu1 %v556_v34  ;;  %358 = vmatprep.mubr.bf16.mxu0 %v430_v37 }
  0x25   :  { %406 = vmatprep.mubr.bf16.mxu1 %v432_v39 }
  0x2b   :  { %359 = vmatmul.mubr.bf16.gmra.mrb[4].mxu0 %v429_v40 }
  0x2c   :  { %407 = vmatmul.mubr.bf16.gmra.mrb[4].mxu1 %v431_v41 }
  0xf6   :  { %v481_v42 = vpop.f32.mrb[0].mxu0 }
  0xf7   :  { %v509_v43 = vpop.f32.mrb[0].mxu1  ;;  %v482_v45 = vpop.f32.mrb[1].mxu0 }
  0xf8   :  { %v483_v46 = vadd.f32 %v482_v45, %v481_v42  ;;  %v510_v47 = vpop.f32.mrb[1].mxu1  ;;  %v484_v48 = vpop.f32.mrb[2].mxu0 }
  0xf9   :  { %v511_v49 = vadd.f32 %v510_v47, %v509_v43  ;;  %v512_v50 = vpop.f32.mrb[2].mxu1  ;;  %v485_v51 = vpop.f32.mrb[3].mxu0 }
  0xfa   :  { %v353_v52 = vadd.f32 %v483_v46, %v424_v44  ;;  %v486_v53 = vadd.f32 %v485_v51, %v484_v48  ;;  %v513_v54 = vpop.f32.mrb[3].mxu1 }
  0xfb   :  { %v514_v55 = vadd.f32 %v513_v54, %v512_v50 }
  0xfc   :  { %v401_v56 = vadd.f32 %v511_v49, %v353_v52  ;;  %v356_v57 = vadd.f32 %v486_v53, %v424_v44 }
  0xfe   :  { %v414_v58 = vmax.f32 %v401_v56, 0.0  ;;  %v404_v59 = vadd.f32 %v514_v55, %v356_v57  ;;  %v487_v60 = vpop.f32.mrb[4].mxu0 }
  0xff   :  { %v515_v61 = vpop.f32.mrb[4].mxu1  ;;  %v488_v62 = vpop.f32.mrb[5].mxu0 }
 0x100   :  { %417 = vst [vmem:[%s712_s3] sm:$0xff] %v414_v58  ;;  %v415_v63 = vmax.f32 %v404_v59, 0.0  ;;  %v489_v0 = vadd.f32 %v488_v62, %v487_v60  ;;  %v516_v1 = vpop.f32.mrb[5].mxu1  ;;  %v490_v2 = vpop.f32.mrb[6].mxu0 }
 0x101   :  { %v517_v3 = vadd.f32 %v516_v1, %v515_v61  ;;  %v518_v4 = vpop.f32.mrb[6].mxu1  ;;  %v491_v5 = vpop.f32.mrb[7].mxu0 }
 0x102   :  { %418 = vst [vmem:[%s712_s3 + $0x8] sm:$0xff] %v415_v63  ;;  %v361_v6 = vadd.f32 %v489_v0, %v424_v44  ;;  %v519_v7 = vpop.f32.mrb[7].mxu1 }
 0x104   :  { %v409_v8 = vadd.f32 %v517_v3, %v361_v6 }
 0x106   :  { %v416_v9 = vmax.f32 %v409_v8, 0.0 }
 0x108   :  { %419 = vst [vmem:[%s712_s3 + $0x10] sm:$0xff] %v416_v9 }

// kernel: dqn_forward.7
= control target key start
LH: loop header
LB: loop body
LE: loop exit
PB: predicated region body
PF: predicated region fallthrough
CT: control target
= control target key end

     0   :  { %v734_v1 = vmov 0   ;;  %vm140_vm0 = vcmask 523264   ;;  %v40_v50 = vlaneseq  ;;  %s921_s1 = inlined_call_operand.vmem [shape: bf16[64,512], index: 1, kind: input, shape index: {}]   ;;  %s922_s3 = inlined_call_operand.vmem [shape: bf16[512,128], index: 3, kind: input, shape index: {}]   ;;  %s923_s0 = inlined_call_operand.vmem [shape: bf16[8,64], index: 0, kind: input, shape index: {}]   ;;  %s924_s2 = inlined_call_operand.vmem [shape: f32[1,512], index: 2, kind: input, shape index: {}]   ;;  %s925_s4 = inlined_call_operand.vmem [shape: f32[1,128], index: 4, kind: input, shape index: {}]   ;;  %s926_s5 = inlined_call_operand.vmem [shape: f32[8,128], index: 5, kind: output, shape index: {}]  }
   0x1   :  { %v678_v0 = vld [vmem:[%s921_s1 + $0x4] ss:$16 sps:$4 sm:$0xff]   ;;  %176 = vmatprep.mubr.bf16.mxu0 %v734_v1  ;;  %217 = vmatprep.mubr.bf16.mxu1 %v734_v1  ;;  %v680_v2 = vld [vmem:[%s921_s1 + $0xc] ss:$16 sps:$4 sm:$0xff]   ;;  %v682_v3 = vld [vmem:[%s921_s1] ss:$16 sps:$4 sm:$0xff]  }
   0x2   :  { %144 = vmatprep.subr.bf16.mxu0 %v678_v0  ;;  %v683_v4 = vld [vmem:[%s921_s1 + $0x8] ss:$16 sps:$4 sm:$0xff]   ;;  %185 = vmatprep.subr.bf16.mxu1 %v680_v2  ;;  %v684_v5 = vld [vmem:[%s921_s1 + $0x24] ss:$16 sps:$4 sm:$0xff]   ;;  %v686_v6 = vld [vmem:[%s921_s1 + $0x2c] ss:$16 sps:$4 sm:$0xff]  }
   0x3   :  { %145 = vmatpush1.bf16.msra.mxu0 %v682_v3  ;;  %186 = vmatpush1.bf16.msra.mxu1 %v683_v4  ;;  %v688_v7 = vld [vmem:[%s921_s1 + $0x20] ss:$16 sps:$4 sm:$0xff]   ;;  %v689_v8 = vld [vmem:[%s921_s1 + $0x28] ss:$16 sps:$4 sm:$0xff]   ;;  %v690_v9 = vld [vmem:[%s921_s1 + $0x44] ss:$16 sps:$4 sm:$0xff]  }
   0x4   :  { %146 = vmatprep.subr.bf16.mxu0 %v684_v5  ;;  %187 = vmatprep.subr.bf16.mxu1 %v686_v6  ;;  %v692_v10 = vld [vmem:[%s921_s1 + $0x4c] ss:$16 sps:$4 sm:$0xff]   ;;  %v694_v11 = vld [vmem:[%s921_s1 + $0x40] ss:$16 sps:$4 sm:$0xff]   ;;  %v695_v12 = vld [vmem:[%s921_s1 + $0x48] ss:$16 sps:$4 sm:$0xff]  }
   0x5   :  { %v696_v13 = vld [vmem:[%s921_s1 + $0x64] ss:$16 sps:$4 sm:$0xff]   ;;  %v698_v14 = vld [vmem:[%s921_s1 + $0x6c] ss:$16 sps:$4 sm:$0xff]   ;;  %v700_v15 = vld [vmem:[%s921_s1 + $0x60] ss:$16 sps:$4 sm:$0xff]  }
   0x6   :  { %v701_v16 = vld [vmem:[%s921_s1 + $0x68] ss:$16 sps:$4 sm:$0xff]   ;;  %v702_v17 = vld [vmem:[%s922_s3 + $0x40] sm:$0xff]   ;;  %v710_v26 = vld [vmem:[%s922_s3 + $0x50] sm:$0xff]   ;;  %v41_v51 = vshrl.u32 %v40_v50, 7 }
   0x7   :  { %147 = vmatpush1.bf16.msra.mxu0 %v688_v7  ;;  %188 = vmatpush1.bf16.msra.mxu1 %v689_v8  ;;  %v703_v18 = vld [vmem:[%s922_s3 + $0xc0] sm:$0xff]   ;;  %v706_v22 = vld [vmem:[%s922_s3 + $0x48] sm:$0xff]   ;;  %v711_v27 = vld [vmem:[%s922_s3 + $0xd0] sm:$0xff]  }
   0x8   :  { %148 = vmatprep.subr.bf16.mxu0 %v690_v9  ;;  %189 = vmatprep.subr.bf16.mxu1 %v692_v10  ;;  %v21_v19 = vld [vmem:[%s923_s0] sm:$0xf]  ;;  %v707_v23 = vld [vmem:[%s922_s3 + $0xc8] sm:$0xff]   ;;  %v712_v28 = vld [vmem:[%s922_s3 + $0x10] sm:$0xff]   ;;  %v42_v52 = vsub.s32 0, %v41_v51  ;;  %v50_v53 = vsub.s32 2, %v41_v51 }
   0x9   :  { %v704_v20 = vld [vmem:[%s922_s3] sm:$0xff]   ;;  %v708_v24 = vld [vmem:[%s922_s3 + $0x8] sm:$0xff]   ;;  %v713_v29 = vld [vmem:[%s922_s3 + $0x90] sm:$0xff]   ;;  %v46_v55 = vsub.s32 1, %v41_v51  ;;  %v54_v56 = vsub.s32 3, %v41_v51 }
   0xa   :  { %v705_v21 = vld [vmem:[%s922_s3 + $0x80] sm:$0xff]   ;;  %v709_v25 = vld [vmem:[%s922_s3 + $0x88] sm:$0xff]   ;;  %v714_v30 = vld [vmem:[%s922_s3 + $0x58] sm:$0xff]  }
   0xb   :  { %149 = vmatpush1.bf16.msra.mxu0 %v694_v11  ;;  %190 = vmatpush1.bf16.msra.mxu1 %v695_v12  ;;  %v715_v31 = vld [vmem:[%s922_s3 + $0xd8] sm:$0xff]   ;;  %v718_v34 = vld [vmem:[%s922_s3 + $0x60] sm:$0xff]   ;;  %v722_v38 = vld [vmem:[%s922_s3 + $0x68] sm:$0xff]  }
   0xc   :  { %150 = vmatprep.subr.bf16.mxu0 %v696_v13  ;;  %191 = vmatprep.subr.bf16.mxu1 %v698_v14  ;;  %v716_v32 = vld [vmem:[%s922_s3 + $0x18] sm:$0xff]   ;;  %v719_v35 = vld [vmem:[%s922_s3 + $0xe0] sm:$0xff]   ;;  %v723_v39 = vld [vmem:[%s922_s3 + $0xe8] sm:$0xff]  }
   0xd   :  { %v717_v33 = vld [vmem:[%s922_s3 + $0x98] sm:$0xff]   ;;  %v720_v36 = vld [vmem:[%s922_s3 + $0x20] sm:$0xff]   ;;  %v724_v40 = vld [vmem:[%s922_s3 + $0x28] sm:$0xff]  }
   0xe   :  { %v721_v37 = vld [vmem:[%s922_s3 + $0xa0] sm:$0xff]   ;;  %v725_v41 = vld [vmem:[%s922_s3 + $0xa8] sm:$0xff]   ;;  %v726_v42 = vld [vmem:[%s922_s3 + $0x70] sm:$0xff]  }
   0xf   :  { %151 = vmatpush1.bf16.msra.mxu0 %v700_v15  ;;  %192 = vmatpush1.bf16.msra.mxu1 %v701_v16  ;;  %v727_v43 = vld [vmem:[%s922_s3 + $0xf0] sm:$0xff]   ;;  %v730_v46 = vld [vmem:[%s922_s3 + $0x78] sm:$0xff]   ;;  %v38_v54 = vld [vmem:[%s924_s2] sm:$0xf] }
  0x10   :  { %633 = vmatprep.subr.bf16.mxu0 %v702_v17  ;;  %655 = vmatprep.subr.bf16.mxu1 %v703_v18  ;;  %v728_v44 = vld [vmem:[%s922_s3 + $0x30] sm:$0xff]   ;;  %v731_v47 = vld [vmem:[%s922_s3 + $0xf8] sm:$0xff]   ;;  %v43_v57 = vrot.slane %v38_v54, %v42_v52  ;;  %v51_v58 = vrot.slane %v38_v54, %v50_v53  ;;  %v47_v59 = vrot.slane %v38_v54, %v46_v55 }
  0x11   :  { %v729_v45 = vld [vmem:[%s922_s3 + $0xb0] sm:$0xff]   ;;  %v732_v48 = vld [vmem:[%s922_s3 + $0x38] sm:$0xff]   ;;  %v55_v60 = vrot.slane %v38_v54, %v54_v56 }
  0x12   :  { %598 = vmatmul.mubr.msk.bf16.vlgmr.msra.gmra.mrb[0].mxu0 %vm140_vm0, %v21_v19  ;;  %599 = vmatmul.mubr.msk.bf16.vlgmr.msra.gmra.mrb[0].mxu1 %vm140_vm0, %v21_v19  ;;  %v733_v49 = vld [vmem:[%s922_s3 + $0xb8] sm:$0xff]   ;;  %v600_v19 = vld [vmem:[%s925_s4] ss:$0 sm:$0xff] }
  0x13   :  { %634 = vmatpush3.bf16.msra.mxu0 %v704_v20  ;;  %656 = vmatpush3.bf16.msra.mxu1 %v705_v21 }
  0x14   :  { %635 = vmatprep.subr.bf16.mxu0 %v706_v22  ;;  %657 = vmatprep.subr.bf16.mxu1 %v707_v23 }
  0x17   :  { %636 = vmatpush3.bf16.msra.mxu0 %v708_v24  ;;  %658 = vmatpush3.bf16.msra.mxu1 %v709_v25 }
  0x18   :  { %637 = vmatprep.subr.bf16.mxu0 %v710_v26  ;;  %659 = vmatprep.subr.bf16.mxu1 %v711_v27 }
  0x1b   :  { %638 = vmatpush3.bf16.msra.mxu0 %v712_v28  ;;  %660 = vmatpush3.bf16.msra.mxu1 %v713_v29 }
  0x1c   :  { %639 = vmatprep.subr.bf16.mxu0 %v714_v30  ;;  %661 = vmatprep.subr.bf16.mxu1 %v715_v31 }
  0x1f   :  { %640 = vmatpush3.bf16.msra.mxu0 %v716_v32  ;;  %662 = vmatpush3.bf16.msra.mxu1 %v717_v33 }
  0x20   :  { %641 = vmatprep.subr.bf16.mxu0 %v718_v34  ;;  %663 = vmatprep.subr.bf16.mxu1 %v719_v35 }
  0x23   :  { %642 = vmatpush3.bf16.msra.mxu0 %v720_v36  ;;  %664 = vmatpush3.bf16.msra.mxu1 %v721_v37 }
  0x24   :  { %643 = vmatprep.subr.bf16.mxu0 %v722_v38  ;;  %665 = vmatprep.subr.bf16.mxu1 %v723_v39 }
  0x27   :  { %644 = vmatpush3.bf16.msra.mxu0 %v724_v40  ;;  %666 = vmatpush3.bf16.msra.mxu1 %v725_v41 }
  0x28   :  { %645 = vmatprep.subr.bf16.mxu0 %v726_v42  ;;  %667 = vmatprep.subr.bf16.mxu1 %v727_v43 }
  0x2b   :  { %646 = vmatpush3.bf16.msra.mxu0 %v728_v44  ;;  %668 = vmatpush3.bf16.msra.mxu1 %v729_v45 }
  0x2c   :  { %647 = vmatprep.subr.bf16.mxu0 %v730_v46  ;;  %669 = vmatprep.subr.bf16.mxu1 %v731_v47 }
  0x2f   :  { %648 = vmatpush3.bf16.msra.mxu0 %v732_v48  ;;  %670 = vmatpush3.bf16.msra.mxu1 %v733_v49 }
  0xe5   :  { %v178_v61 = vpop.f32.mrb[0].mxu0  ;;  %v219_v62 = vpop.f32.mrb[0].mxu1 }
  0xe6   :  { %v179_v63 = vadd.f32 %v178_v61, %v43_v57  ;;  %v220_v0 = vadd.f32 %v219_v62, %v51_v58  ;;  %v180_v1 = vpop.f32.mrb[1].mxu0  ;;  %v221_v2 = vpop.f32.mrb[1].mxu1 }
  0xe7   :  { %v181_v3 = vadd.f32 %v180_v1, %v47_v59  ;;  %v222_v4 = vadd.f32 %v221_v2, %v55_v60  ;;  %v182_v5 = vpop.f32.mrb[2].mxu0  ;;  %v223_v6 = vpop.f32.mrb[2].mxu1 }
  0xe8   :  { %v226_v7 = vmax.f32 %v179_v63, 0.0  ;;  %v228_v8 = vmax.f32 %v220_v0, 0.0  ;;  %v183_v9 = vpop.f32.mrb[3].mxu0  ;;  %v224_v10 = vpop.f32.mrb[3].mxu1 }
  0xe9   :  { %v227_v11 = vmax.f32 %v181_v3, 0.0  ;;  %v229_v12 = vmax.f32 %v222_v4, 0.0 }
  0xea   :  { %v232_v13 = vpack.c.bf16 %v228_v8, %v228_v8  ;;  %v230_v16 = vpack.c.bf16 %v226_v7, %v226_v7 }
  0xeb   :  { %v231_v14 = vpack.c.bf16 %v227_v11, %v227_v11  ;;  %v233_v15 = vpack.c.bf16 %v229_v12, %v229_v12 }
  0xed   :  { %529 = vmatprep.mubr.bf16.mxu0 %v231_v14  ;;  %569 = vmatprep.mubr.bf16.mxu1 %v233_v15 }
  0xee   :  { %530 = vmatmul.mubr.bf16.vlgmr.msra.gmra.mrb[4].mxu0 %v230_v16  ;;  %570 = vmatmul.mubr.bf16.vlgmr.msra.gmra.mrb[4].mxu1 %v232_v13 }
 0x1c1   :  { %v649_v17 = vpop.f32.mrb[4].mxu0  ;;  %v671_v18 = vpop.f32.mrb[4].mxu1 }
 0x1c2   :  { %v650_v20 = vpop.f32.mrb[5].mxu0  ;;  %v672_v21 = vpop.f32.mrb[5].mxu1 }
 0x1c3   :  { %v651_v22 = vadd.f32 %v650_v20, %v649_v17  ;;  %v673_v23 = vadd.f32 %v672_v21, %v671_v18  ;;  %v652_v24 = vpop.f32.mrb[6].mxu0  ;;  %v674_v25 = vpop.f32.mrb[6].mxu1 }
 0x1c4   :  { %v653_v26 = vpop.f32.mrb[7].mxu0  ;;  %v675_v27 = vpop.f32.mrb[7].mxu1 }
 0x1c5   :  { %v532_v28 = vadd.f32 %v651_v22, %v600_v19 }
 0x1c7   :  { %v572_v29 = vadd.f32 %v673_v23, %v532_v28 }
 0x1c9   :  { %577 = vst [vmem:[%s926_s5] sm:$0xff] %v572_v29 }

// kernel: dqn_forward.6
= control target key start
LH: loop header
LB: loop body
LE: loop exit
PB: predicated region body
PF: predicated region fallthrough
CT: control target
= control target key end

     0   :  { %v607_v35 = vmov 0.0   ;;  %vm608_vm0 = vmmov 0   ;;  %vm330_vm1 = vcmask 523264   ;;  %s752_s1 = inlined_call_operand.vmem [shape: bf16[576,128], index: 1, kind: input, shape index: {}]   ;;  %s753_s0 = inlined_call_operand.vmem [shape: bf16[8,576], index: 0, kind: input, shape index: {}]   ;;  %s754_s2 = inlined_call_operand.vmem [shape: f32[1,128], index: 2, kind: input, shape index: {}]   ;;  %s755_s3 = inlined_call_operand.vmem [shape: f32[8,128], index: 3, kind: output, shape index: {}]  }
   0x1   :  { %v566_v0 = vld [vmem:[%s752_s1 + $0x40] sm:$0xff]   ;;  %v570_v4 = vld [vmem:[%s752_s1 + $0x48] sm:$0xff]   ;;  %v574_v8 = vld [vmem:[%s752_s1 + $0x50] sm:$0xff]  }
   0x2   :  { %v567_v1 = vld [vmem:[%s752_s1] sm:$0xff]   ;;  %503 = vmatprep.subr.bf16.mxu0 %v566_v0  ;;  %v571_v5 = vld [vmem:[%s752_s1 + $0x8] sm:$0xff]   ;;  %v575_v9 = vld [vmem:[%s752_s1 + $0x10] sm:$0xff]  }
   0x3   :  { %v568_v2 = vld [vmem:[%s752_s1 + $0xc0] sm:$0xff]   ;;  %504 = vmatpush3.bf16.msra.mxu0 %v567_v1  ;;  %v572_v6 = vld [vmem:[%s752_s1 + $0xc8] sm:$0xff]   ;;  %v576_v10 = vld [vmem:[%s752_s1 + $0xd0] sm:$0xff]  }
   0x4   :  { %v569_v3 = vld [vmem:[%s752_s1 + $0x80] sm:$0xff]   ;;  %525 = vmatprep.subr.bf16.mxu1 %v568_v2  ;;  %505 = vmatprep.subr.bf16.mxu0 %v570_v4  ;;  %v573_v7 = vld [vmem:[%s752_s1 + $0x88] sm:$0xff]   ;;  %v577_v11 = vld [vmem:[%s752_s1 + $0x90] sm:$0xff]  }
   0x5   :  { %526 = vmatpush3.bf16.msra.mxu1 %v569_v3  ;;  %v578_v12 = vld [vmem:[%s752_s1 + $0x58] sm:$0xff]   ;;  %v582_v16 = vld [vmem:[%s752_s1 + $0x60] sm:$0xff]   ;;  %v586_v20 = vld [vmem:[%s752_s1 + $0x68] sm:$0xff]  }
   0x6   :  { %527 = vmatprep.subr.bf16.mxu1 %v572_v6  ;;  %v579_v13 = vld [vmem:[%s752_s1 + $0x18] sm:$0xff]   ;;  %v583_v17 = vld [vmem:[%s752_s1 + $0x20] sm:$0xff]   ;;  %v587_v21 = vld [vmem:[%s752_s1 + $0x28] sm:$0xff]  }
   0x7   :  { %506 = vmatpush3.bf16.msra.mxu0 %v571_v5  ;;  %v580_v14 = vld [vmem:[%s752_s1 + $0xd8] sm:$0xff]   ;;  %v584_v18 = vld [vmem:[%s752_s1 + $0xe0] sm:$0xff]   ;;  %v588_v22 = vld [vmem:[%s752_s1 + $0xe8] sm:$0xff]  }
   0x8   :  { %507 = vmatprep.subr.bf16.mxu0 %v574_v8  ;;  %v581_v15 = vld [vmem:[%s752_s1 + $0x98] sm:$0xff]   ;;  %v585_v19 = vld [vmem:[%s752_s1 + $0xa0] sm:$0xff]   ;;  %v589_v23 = vld [vmem:[%s752_s1 + $0xa8] sm:$0xff]  }
   0x9   :  { %528 = vmatpush3.bf16.msra.mxu1 %v573_v7  ;;  %v590_v24 = vld [vmem:[%s752_s1 + $0x70] sm:$0xff]   ;;  %v594_v28 = vld [vmem:[%s752_s1 + $0x78] sm:$0xff]   ;;  %v15_v31 = vld [vmem:[%s753_s0] sm:$0xff] }
   0xa   :  { %529 = vmatprep.subr.bf16.mxu1 %v576_v10  ;;  %v591_v25 = vld [vmem:[%s752_s1 + $0x30] sm:$0xff]   ;;  %v595_v29 = vld [vmem:[%s752_s1 + $0x38] sm:$0xff]   ;;  %v461_v32 = vcombine.low %v15_v31, %v15_v31  ;;  %v462_v33 = vcombine.high %v15_v31, %v15_v31  ;;  %v16_v36 = vld [vmem:[%s753_s0 + $0x8] sm:$0xff] }
   0xb   :  { %508 = vmatpush3.bf16.msra.mxu0 %v575_v9  ;;  %v592_v26 = vld [vmem:[%s752_s1 + $0xf0] sm:$0xff]   ;;  %v596_v30 = vld [vmem:[%s752_s1 + $0xf8] sm:$0xff]   ;;  %v463_v37 = vcombine.low %v16_v36, %v16_v36  ;;  %v464_v38 = vcombine.high %v16_v36, %v16_v36  ;;  %v603_v39 = vld [vmem:[%s752_s1 + $0x100] sm:$0xff]  }
   0xc   :  { %509 = vmatprep.subr.bf16.mxu0 %v578_v12  ;;  %v593_v27 = vld [vmem:[%s752_s1 + $0xb0] sm:$0xff]   ;;  %v600_v34 = vld [vmem:[%s752_s1 + $0xb8] sm:$0xff]   ;;  %366 = vmatprep.mubr.bf16.mxu0 %v462_v33  ;;  %v604_v40 = vld [vmem:[%s752_s1 + $0x108] sm:$0xff]  }
   0xd   :  { %530 = vmatpush3.bf16.msra.mxu1 %v577_v11  ;;  %406 = vmatprep.mubr.bf16.mxu1 %v464_v38  ;;  %v605_v41 = vld [vmem:[%s752_s1 + $0x110] sm:$0xff]   ;;  %v606_v42 = vld [vmem:[%s752_s1 + $0x118] sm:$0xff]   ;;  %v460_v45 = vld [vmem:[%s754_s2] ss:$0 sm:$0xff] }
   0xe   :  { %531 = vmatprep.subr.bf16.mxu1 %v580_v14  ;;  %v599_v43 = vld [vmem:[%s753_s0 + $0x10] ss:$0 sps:$4 sm:$0xff]  }
   0xf   :  { %510 = vmatpush3.bf16.msra.mxu0 %v579_v13 }
  0x10   :  { %511 = vmatprep.subr.bf16.mxu0 %v582_v16 }
  0x11   :  { %532 = vmatpush3.bf16.msra.mxu1 %v581_v15 }
  0x12   :  { %533 = vmatprep.subr.bf16.mxu1 %v584_v18 }
  0x13   :  { %512 = vmatpush3.bf16.msra.mxu0 %v583_v17 }
  0x14   :  { %513 = vmatprep.subr.bf16.mxu0 %v586_v20 }
  0x15   :  { %534 = vmatpush3.bf16.msra.mxu1 %v585_v19 }
  0x16   :  { %535 = vmatprep.subr.bf16.mxu1 %v588_v22 }
  0x17   :  { %514 = vmatpush3.bf16.msra.mxu0 %v587_v21 }
  0x18   :  { %515 = vmatprep.subr.bf16.mxu0 %v590_v24 }
  0x19   :  { %536 = vmatpush3.bf16.msra.mxu1 %v589_v23 }
  0x1a   :  { %537 = vmatprep.subr.bf16.mxu1 %v592_v26 }
  0x1b   :  { %516 = vmatpush3.bf16.msra.mxu0 %v591_v25 }
  0x1c   :  { %517 = vmatprep.subr.bf16.mxu0 %v594_v28 }
  0x1d   :  { %538 = vmatpush3.bf16.msra.mxu1 %v593_v27 }
  0x1e   :  { %539 = vmatprep.subr.bf16.mxu1 %v596_v30 }
  0x1f   :  { %518 = vmatpush3.bf16.msra.mxu0 %v595_v29 }
  0x20   :  { %552 = vmatprep.subr.bf16.mxu0 %v607_v35 }
  0x21   :  { %540 = vmatpush3.bf16.msra.mxu1 %v600_v34 }
  0x22   :  { %367 = vmatmul.mubr.bf16.vlgmr.msra.gmra.mrb[0].mxu0 %v461_v32 }
  0x23   :  { %553 = vmatpush3.bf16.msra.mxu0 %v603_v39  ;;  %560 = vmatprep.mubr.msk.bf16.mxu0 %vm608_vm0, %v607_v35 }
  0x24   :  { %407 = vmatmul.mubr.bf16.vlgmr.msra.gmra.mrb[0].mxu1 %v463_v37  ;;  %554 = vmatprep.subr.bf16.mxu0 %v607_v35 }
  0x27   :  { %555 = vmatpush3.bf16.msra.mxu0 %v604_v40 }
  0x28   :  { %556 = vmatprep.subr.bf16.mxu0 %v607_v35 }
  0x2b   :  { %557 = vmatpush3.bf16.msra.mxu0 %v605_v41 }
  0x2c   :  { %558 = vmatprep.subr.bf16.mxu0 %v607_v35 }
  0x2f   :  { %559 = vmatpush3.bf16.msra.mxu0 %v606_v42 }
  0x32   :  { %561 = vmatmul.mubr.msk.bf16.vlgmr.msra.gmra.mrb[4].mxu0 %vm330_vm1, %v599_v43 }
  0xf5   :  { %v519_v44 = vpop.f32.mrb[0].mxu0 }
  0xf6   :  { %v520_v46 = vpop.f32.mrb[1].mxu0 }
  0xf7   :  { %v521_v47 = vadd.f32 %v520_v46, %v519_v44  ;;  %v522_v48 = vpop.f32.mrb[2].mxu0  ;;  %v541_v49 = vpop.f32.mrb[0].mxu1 }
  0xf8   :  { %v523_v50 = vpop.f32.mrb[3].mxu0  ;;  %v542_v51 = vpop.f32.mrb[1].mxu1 }
  0xf9   :  { %v369_v52 = vadd.f32 %v521_v47, %v460_v45  ;;  %v543_v53 = vadd.f32 %v542_v51, %v541_v49  ;;  %v544_v54 = vpop.f32.mrb[2].mxu1 }
  0xfa   :  { %v545_v55 = vpop.f32.mrb[3].mxu1 }
  0xfb   :  { %v409_v56 = vadd.f32 %v543_v53, %v369_v52 }
 0x105   :  { %v448_v57 = vpop.f32.mrb[4].mxu0 }
 0x106   :  { %v449_v58 = vadd.f32 %v448_v57, %v409_v56  ;;  %v562_v59 = vpop.f32.mrb[5].mxu0 }
 0x107   :  { %v451_v60 = vpop.f32.mrb[6].mxu0 }
 0x108   :  { %v454_v61 = vmax.f32 %v449_v58, 0.0  ;;  %v563_v62 = vpop.f32.mrb[7].mxu0 }
 0x10a   :  { %455 = vst [vmem:[%s755_s3] sm:$0xff] %v454_v61 }

</bundles_post_ra>
